<compile_context>
chip_gen: v7x
topology: tpu7x:2x2x1
jax: 0.10.0
libtpu: 0.0.40
codegen_flags: <defaults>
</compile_context>

<pallas_src>
import functools

import jax
import jax.numpy as jnp
from jax import lax
from jax.experimental import pallas as pl
from jax.experimental.pallas import tpu as pltpu

_SUBLANES = 8          # strip height == sublanes of one f32 vreg
_FALLBACK_LANES = 512  # lane-dense width for the narrow/1-D fallback path


def _round_up(x, m):
    return (x + m - 1) // m * m


def _bce_partial_kernel(yp_ref, yt_ref, m_ref, num_ref, den_ref, *,
                        eps, tile_rows, rows_total, ragged, binary_targets):
    """One grid step: (tile_rows, W) inputs -> (8, W) partial num/den sums.

    Strip loop over 8-row slices; accumulates masked loss straight into the
    output block (pure VPU vreg adds, tiny live temporaries).
    """
    num_ref[...] = jnp.zeros_like(num_ref)
    den_ref[...] = jnp.zeros_like(den_ref)

    row_base = pl.program_id(0) * tile_rows
    n_strips = tile_rows // _SUBLANES

    def strip(s, carry):
        r0 = pl.multiple_of(s * _SUBLANES, _SUBLANES)
        yp = yp_ref[pl.ds(r0, _SUBLANES), :].astype(jnp.float32)
        yt = yt_ref[pl.ds(r0, _SUBLANES), :].astype(jnp.float32)
        m = m_ref[pl.ds(r0, _SUBLANES), :].astype(jnp.float32)

        if ragged:
            # Only the last grid step can overhang the row extent; garbage rows
            # are clamped to harmless values and given zero mask weight.
            row_ids = row_base + r0 + lax.broadcasted_iota(
                jnp.int32, (_SUBLANES, 1), 0)
            valid = row_ids < rows_total
            yp = jnp.where(valid, yp, 0.5)
            yt = jnp.where(valid, yt, 0.0)
            m = jnp.where(valid, m, 0.0)

        if binary_targets:
            # One EUP log per element; only valid for hard 0/1 targets.
            sel = jnp.where(yt > 0.5, yp, 1.0 - yp)
            loss = -jnp.log(sel + eps)
        else:
            loss = -(yt * jnp.log(yp + eps)
                     + (1.0 - yt) * jnp.log(1.0 - yp + eps))

        num_ref[...] += loss * m
        den_ref[...] += m
        return carry

    lax.fori_loop(0, n_strips, strip, 0)


def binary_cross_entropy(y_pred, y_true, mask, *, eps=1e-8,
                         block_bytes=4 << 20, binary_targets=False):
    """Masked BCE: sum(loss*mask)/sum(mask) as a scalar float32.

    Matches the CARCA PyTorch module (eps inside the log; NaN if sum(mask)==0).
    Inputs may be bf16 (or f32): the kernel upcasts to f32 on load, so passing
    bf16 halves HBM traffic (recommended on v5e) without wrapper-side casts.
    """
    assert y_pred.shape == y_true.shape == mask.shape
    n = int(y_pred.size)

    shape = y_pred.shape
    width = shape[-1] if len(shape) >= 2 else n
    # Natural layout: stream the arrays as (rows, width) directly — no pad, no
    # ravel, no reshape materialization.  Fallback only for narrow / 1-D / very
    # wide-row inputs where a (8, width) strip would be unusable.
    natural = (len(shape) >= 2 and width >= 128
               and _SUBLANES * width * 4 <= (8 << 20))

    if natural:
        w = width
        rows = n // width

        def _prep(x, fill):
            del fill
            return x if x.ndim == 2 else x.reshape(-1, width)
    else:
        # Narrow/1-D fallback: flatten into a lane-dense (rows, 512) slab.
        # (One extra HBM pass; only taken when the natural layout is unusable.)
        w = _FALLBACK_LANES
        rows = _round_up(pl.cdiv(n, w), _SUBLANES)
        pad_n = rows * w - n

        def _prep(x, fill):
            x = jnp.ravel(x)
            if pad_n:
                # mask padded with 0 -> padded elements contribute nothing;
                # y_pred padded with 0.5 keeps log() finite.
                x = jnp.pad(x, (0, pad_n), constant_values=fill)
            return x.reshape(rows, w)

    yp2 = _prep(y_pred, 0.5)
    yt2 = _prep(y_true, 0.0)
    m2 = _prep(mask, 0.0)

    # Row-tile sizing: ~block_bytes (f32) per input block, multiple of 8 rows,
    # but keep >=4 grid steps when the array is big enough so the DMA pipeline
    # has work to overlap and v7x megacore can split the grid across both TCs.
    tr = max(_SUBLANES, (block_bytes // (4 * w)) // _SUBLANES * _SUBLANES)
    quarter = max(_SUBLANES, (rows // 4) // _SUBLANES * _SUBLANES)
    tr = min(tr, quarter, _round_up(rows, _SUBLANES))
    grid = pl.cdiv(rows, tr)
    ragged = (rows % tr) != 0   # only then does the last block overhang rows

    # Tile-proportional VMEM budget: 3 inputs x 2 pipeline buffers + ~2 tiles
    # of temporaries headroom + 2 outputs x 2 buffers + fixed slack, capped so
    # it fits v7x's 64 MiB physical VMEM (v5e/v6e have 128 MiB).
    in_blk = tr * w * 4
    out_blk = _SUBLANES * w * 4
    vmem_limit = 3 * 2 * in_blk + 2 * in_blk + 2 * 2 * out_blk + (4 << 20)
    vmem_limit = int(min(max(vmem_limit, 16 << 20), 48 << 20))

    in_spec = pl.BlockSpec((tr, w), lambda i: (i, 0))
    out_spec = pl.BlockSpec((None, _SUBLANES, w), lambda i: (i, 0, 0))

    in_bytes = sum(int(a.size) * a.dtype.itemsize for a in (yp2, yt2, m2))
    out_bytes = 2 * grid * _SUBLANES * w * 4
    cost = pl.CostEstimate(
        flops=8 * n,
        transcendentals=(1 if binary_targets else 2) * n,
        bytes_accessed=in_bytes + out_bytes,
    )

    kernel = functools.partial(
        _bce_partial_kernel,
        eps=float(eps),
        tile_rows=tr,
        rows_total=rows,
        ragged=ragged,
        binary_targets=binary_targets,
    )

    num_part, den_part = pl.pallas_call(
        kernel,
        out_shape=(
            jax.ShapeDtypeStruct((grid, _SUBLANES, w), jnp.float32),
            jax.ShapeDtypeStruct((grid, _SUBLANES, w), jnp.float32),
        ),
        grid_spec=pltpu.PrefetchScalarGridSpec(
            num_scalar_prefetch=0,
            grid=(grid,),
            in_specs=[in_spec, in_spec, in_spec],
            out_specs=(out_spec, out_spec),
        ),
        compiler_params=pltpu.CompilerParams(
            dimension_semantics=("parallel",),   # independent partials per step
            vmem_limit_bytes=vmem_limit,
        ),
        cost_estimate=cost,
    )(yp2, yt2, m2)

    # Tiny epilogue in plain JAX: cross-lane/cross-block reduce + division.
    # Denominator intentionally not clamped -> NaN when mask is all zero,
    # matching the PyTorch module.
    return jnp.sum(num_part) / jnp.sum(den_part)


def _reference(y_pred, y_true, mask, eps=1e-8):
    loss = -(y_true * jnp.log(y_pred + eps)
             + (1.0 - y_true) * jnp.log(1.0 - y_pred + eps))
    return jnp.sum(loss * mask) / jnp.sum(mask)


if __name__ == "__main__":
    key = jax.random.PRNGKey(0)
    k1, k2, k3, k4, k5, k6 = jax.random.split(key, 6)

    # Small demo shapes consistent with the CARCA usage (batch x seq scores).
    R, C = 16, 256
    y_pred = jax.random.uniform(k1, (R, C), jnp.float32, minval=0.01, maxval=0.99)
    y_true = (jax.random.uniform(k2, (R, C), jnp.float32) > 0.5).astype(jnp.float32)
    mask = (jax.random.uniform(k3, (R, C), jnp.float32) > 0.3).astype(jnp.float32)

    loss = binary_cross_entropy(y_pred, y_true, mask)
    jax.block_until_ready(loss)
    ref = _reference(y_pred, y_true, mask)
    assert jnp.allclose(loss, ref, rtol=1e-5, atol=1e-6), (loss, ref)

    # Ragged-row case (row count not a multiple of the tile) exercises the
    # in-kernel tail masking that replaced the wrapper-side padding.
    R2, C2 = 13, 384
    yp2 = jax.random.uniform(k4, (R2, C2), jnp.float32, minval=0.01, maxval=0.99)
    yt2 = (jax.random.uniform(k5, (R2, C2), jnp.float32) > 0.5).astype(jnp.float32)
    m2 = (jax.random.uniform(k6, (R2, C2), jnp.float32) > 0.3).astype(jnp.float32)

    loss2 = binary_cross_entropy(yp2, yt2, m2)
    jax.block_until_ready(loss2)
    ref2 = _reference(yp2, yt2, m2)
    assert jnp.allclose(loss2, ref2, rtol=1e-5, atol=1e-6), (loss2, ref2)

    print("KERNEL_OK")
</pallas_src>

<mosaic_0001>
module attributes {stable_mosaic.version = 11 : i64} {
  func.func @_bce_partial_kernel(%arg0: i32, %arg1: memref<8x256xf32, #tpu.memory_space<vmem>>, %arg2: memref<8x256xf32, #tpu.memory_space<vmem>>, %arg3: memref<8x256xf32, #tpu.memory_space<vmem>>, %arg4: memref<1x8x256xf32, #tpu.memory_space<vmem>>, %arg5: memref<1x8x256xf32, #tpu.memory_space<vmem>>) attributes {dimension_semantics = [#tpu.dimension_semantics<parallel>], iteration_bounds = array<i64: 2>, scalar_prefetch = 0 : i64, scratch_operands = 0 : i64, tpu.core_type = #tpu.core_type<tc>, window_params = [{transform_indices = @transform_0, window_bounds = array<i64: 8, 256>}, {transform_indices = @transform_1, window_bounds = array<i64: 8, 256>}, {transform_indices = @transform_2, window_bounds = array<i64: 8, 256>}, {transform_indices = @transform_3, window_bounds = array<i64: 1, 8, 256>}, {transform_indices = @transform_4, window_bounds = array<i64: 1, 8, 256>}]} {
    %cst = arith.constant 0.000000e+00 : f32
    %0 = vector.broadcast %cst : f32 to vector<8x256xf32>
    %c0 = arith.constant 0 : index
    %c0_0 = arith.constant 0 : index
    %c0_1 = arith.constant 0 : index
    %1 = vector.load %arg4[%c0, %c0_0, %c0_1] : memref<1x8x256xf32, #tpu.memory_space<vmem>>, vector<1x8x256xf32>
    %2 = vector.shape_cast %1 : vector<1x8x256xf32> to vector<8x256xf32>
    %3 = vector.shape_cast %0 : vector<8x256xf32> to vector<1x8x256xf32>
    tpu.vector_store %arg4[%c0, %c0_0, %c0_1], %3 {strides = array<i32>} : memref<1x8x256xf32, #tpu.memory_space<vmem>>, vector<1x8x256xf32>,
    %cst_2 = arith.constant 0.000000e+00 : f32
    %4 = vector.broadcast %cst_2 : f32 to vector<8x256xf32>
    %c0_3 = arith.constant 0 : index
    %c0_4 = arith.constant 0 : index
    %c0_5 = arith.constant 0 : index
    %5 = vector.load %arg5[%c0_3, %c0_4, %c0_5] : memref<1x8x256xf32, #tpu.memory_space<vmem>>, vector<1x8x256xf32>
    %6 = vector.shape_cast %5 : vector<1x8x256xf32> to vector<8x256xf32>
    %7 = vector.shape_cast %4 : vector<8x256xf32> to vector<1x8x256xf32>
    tpu.vector_store %arg5[%c0_3, %c0_4, %c0_5], %7 {strides = array<i32>} : memref<1x8x256xf32, #tpu.memory_space<vmem>>, vector<1x8x256xf32>,
    %c0_i32 = arith.constant 0 : i32
    %c8_i32 = arith.constant 8 : i32
    %8 = arith.muli %c0_i32, %c8_i32 : i32
    %9 = tpu.assume_multiple %8, 8 : i32
    %10 = arith.index_cast %9 : i32 to index
    %c0_6 = arith.constant 0 : index
    %11 = vector.load %arg1[%10, %c0_6] : memref<8x256xf32, #tpu.memory_space<vmem>>, vector<8x256xf32>
    %12 = arith.index_cast %9 : i32 to index
    %c0_7 = arith.constant 0 : index
    %13 = vector.load %arg2[%12, %c0_7] : memref<8x256xf32, #tpu.memory_space<vmem>>, vector<8x256xf32>
    %14 = arith.index_cast %9 : i32 to index
    %c0_8 = arith.constant 0 : index
    %15 = vector.load %arg3[%14, %c0_8] : memref<8x256xf32, #tpu.memory_space<vmem>>, vector<8x256xf32>
    %cst_9 = arith.constant 9.99999993E-9 : f32
    %16 = vector.broadcast %cst_9 : f32 to vector<8x256xf32>
    %17 = arith.addf %11, %16 : vector<8x256xf32>
    %18 = math.log %17 : vector<8x256xf32>
    %19 = arith.mulf %13, %18 : vector<8x256xf32>
    %cst_10 = arith.constant 1.000000e+00 : f32
    %20 = vector.broadcast %cst_10 : f32 to vector<8x256xf32>
    %21 = arith.subf %20, %13 : vector<8x256xf32>
    %cst_11 = arith.constant 1.000000e+00 : f32
    %22 = vector.broadcast %cst_11 : f32 to vector<8x256xf32>
    %23 = arith.subf %22, %11 : vector<8x256xf32>
    %cst_12 = arith.constant 9.99999993E-9 : f32
    %24 = vector.broadcast %cst_12 : f32 to vector<8x256xf32>
    %25 = arith.addf %23, %24 : vector<8x256xf32>
    %26 = math.log %25 : vector<8x256xf32>
    %27 = arith.mulf %21, %26 : vector<8x256xf32>
    %28 = arith.addf %19, %27 : vector<8x256xf32>
    %cst_13 = arith.constant 0.000000e+00 : f32
    %29 = vector.broadcast %cst_13 : f32 to vector<8x256xf32>
    %30 = arith.subf %29, %28 : vector<8x256xf32>
    %c0_14 = arith.constant 0 : index
    %c0_15 = arith.constant 0 : index
    %c0_16 = arith.constant 0 : index
    %31 = vector.load %arg4[%c0_14, %c0_15, %c0_16] : memref<1x8x256xf32, #tpu.memory_space<vmem>>, vector<1x8x256xf32>
    %32 = vector.shape_cast %31 : vector<1x8x256xf32> to vector<8x256xf32>
    %33 = arith.mulf %30, %15 : vector<8x256xf32>
    %34 = arith.addf %32, %33 : vector<8x256xf32>
    %c0_17 = arith.constant 0 : index
    %c0_18 = arith.constant 0 : index
    %c0_19 = arith.constant 0 : index
    %35 = vector.load %arg4[%c0_17, %c0_18, %c0_19] : memref<1x8x256xf32, #tpu.memory_space<vmem>>, vector<1x8x256xf32>
    %36 = vector.shape_cast %35 : vector<1x8x256xf32> to vector<8x256xf32>
    %37 = vector.shape_cast %34 : vector<8x256xf32> to vector<1x8x256xf32>
    tpu.vector_store %arg4[%c0_17, %c0_18, %c0_19], %37 {strides = array<i32>} : memref<1x8x256xf32, #tpu.memory_space<vmem>>, vector<1x8x256xf32>,
    %c0_20 = arith.constant 0 : index
    %c0_21 = arith.constant 0 : index
    %c0_22 = arith.constant 0 : index
    %38 = vector.load %arg5[%c0_20, %c0_21, %c0_22] : memref<1x8x256xf32, #tpu.memory_space<vmem>>, vector<1x8x256xf32>
    %39 = vector.shape_cast %38 : vector<1x8x256xf32> to vector<8x256xf32>
    %40 = arith.addf %39, %15 : vector<8x256xf32>
    %c0_23 = arith.constant 0 : index
    %c0_24 = arith.constant 0 : index
    %c0_25 = arith.constant 0 : index
    %41 = vector.load %arg5[%c0_23, %c0_24, %c0_25] : memref<1x8x256xf32, #tpu.memory_space<vmem>>, vector<1x8x256xf32>
    %42 = vector.shape_cast %41 : vector<1x8x256xf32> to vector<8x256xf32>
    %43 = vector.shape_cast %40 : vector<8x256xf32> to vector<1x8x256xf32>
    tpu.vector_store %arg5[%c0_23, %c0_24, %c0_25], %43 {strides = array<i32>} : memref<1x8x256xf32, #tpu.memory_space<vmem>>, vector<1x8x256xf32>,
    %c1_i32 = arith.constant 1 : i32
    return
  }
  func.func @transform_0(%arg0: i32) -> (i32, i32) {
    %c0_i32 = arith.constant 0 : i32
    %c0_i32_0 = arith.constant 0 : i32
    return %arg0, %c0_i32 : i32, i32
  }
  func.func @transform_1(%arg0: i32) -> (i32, i32) {
    %c0_i32 = arith.constant 0 : i32
    %c0_i32_0 = arith.constant 0 : i32
    return %arg0, %c0_i32 : i32, i32
  }
  func.func @transform_2(%arg0: i32) -> (i32, i32) {
    %c0_i32 = arith.constant 0 : i32
    %c0_i32_0 = arith.constant 0 : i32
    return %arg0, %c0_i32 : i32, i32
  }
  func.func @transform_3(%arg0: i32) -> (i32, i32, i32) {
    %c0_i32 = arith.constant 0 : i32
    %c0_i32_0 = arith.constant 0 : i32
    %c0_i32_1 = arith.constant 0 : i32
    return %arg0, %c0_i32, %c0_i32_0 : i32, i32, i32
  }
  func.func @transform_4(%arg0: i32) -> (i32, i32, i32) {
    %c0_i32 = arith.constant 0 : i32
    %c0_i32_0 = arith.constant 0 : i32
    %c0_i32_1 = arith.constant 0 : i32
    return %arg0, %c0_i32, %c0_i32_0 : i32, i32, i32
  }
}

</mosaic_0001>

<bundles_post_ra>
// kernel: tpu_custom_call.1
= control target key start
LH: loop header
LB: loop body
LE: loop exit
PB: predicated region body
PF: predicated region fallthrough
CT: control target
= control target key end

     0   :  { %s1138_s0 = inlined_call_operand.hbm [shape: f32[16,256], index: 0, kind: input, shape index: {}]   ;;  %s1139_s1 = inlined_call_operand.hbm [shape: f32[16,256], index: 1, kind: input, shape index: {}]   ;;  %s1140_s2 = inlined_call_operand.hbm [shape: f32[16,256], index: 2, kind: input, shape index: {}]   ;;  %s1141_s3 = inlined_call_operand.hbm [shape: f32[2,8,256], index: 3, kind: output, shape index: {0}]   ;;  %s1142_s4 = inlined_call_operand.hbm [shape: f32[2,8,256], index: 4, kind: output, shape index: {1}]  }
   0x1   :  { %1147 = sst [smem:[#allocation16_spill]] %s1139_s1 }
   0x2   :  { %10 = vsyncpa [#allocation3], 0 }
   0x3   :  { %12 = vsyncpa [#allocation3 + $0x1], 0 }
   0x4   :  { %13 = vsyncpa [#allocation6], 0 }
   0x5   :  { %15 = vsyncpa [#allocation6 + $0x1], 0 }
   0x6   :  { %16 = vsyncpa [#allocation4], 0 }
   0x7   :  { %18 = vsyncpa [#allocation4 + $0x1], 0 }
   0x8   :  { %19 = vsyncpa [#allocation10], 0 }
   0x9   :  { %21 = vsyncpa [#allocation10 + $0x1], 0  ;;  %s857_s15 = smov 0   ;;  %s859_s16 = smov 0  }
   0xa   :  { %s861_s17 = smov 0   ;;  %s863_s18 = smov 0  }
   0xb LB: > { %s878_s19 = sadd.s32 4294967295, %s825_s18   ;;  %s532_s20 = sadd.s32 4294967294, %s825_s18   ;;  %s825_s18 = sphi %s863_s18, %s1168_s18   ;;  %s821_s17 = sphi %s861_s17, %s1167_s17   ;;  %s817_s16 = sphi %s859_s16, %s1166_s16   ;;  %s813_s15 = sphi %s857_s15, %s1165_s15  }
   0xc   : > { %s882_s21 = sadd.s32 1, %s825_s18   ;;  %s34_s22 = sadd.s32 1, %s821_s17 }
   0xd   : > { %s31_s23 = ssub.s32 %s825_s18, %s882_s21  ;;  %p41_p0 = scmp.ne.s32.totalorder %s821_s17, %s817_s16 }
   0xe   : > { %p32_p1 = scmp.eq.s32.totalorder %s31_s23, 0  ;;  %p42_p2 = scmp.eq.s32.totalorder %s825_s18, 0 }
   0xf   : > { %p47_p3 = scmp.ne.s32.totalorder %s817_s16, %s813_s15  ;;  %p48_p4 = scmp.eq.s32.totalorder %s878_s19, 0 }
  0x10   : > { %s894_s24 = scalar_select %p32_p1, %s821_s17, %s34_s22  }
  0x11   : > { %p43_p5 = por %p42_p2, %p41_p0  ;;  %p896_p6 = por %p48_p4, %p47_p3 }
  0x12   : > { %1148 = sst [smem:[#allocation15_spill]] %s894_s24  ;;  %p123_p7 = scmp.eq.s32.totalorder %s878_s19, 1 }
  0x13   : > { %s1149_s25 = scalar_select %p896_p6, 1, 0 }
  0x14   : > { %p129_p8 = scmp.eq.s32.totalorder %s532_s20, 1  ;;  %p590_p10 = scmp.lt.s32.totalorder %s825_s18, 2 }
  0x15   : > { %p903_p11 = por %p123_p7, %p41_p0  ;;  %s175_s28 = sand.u32 1, %s821_s17  }
  0x16   : > { %p907_p12 = por %p129_p8, %p47_p3  ;;  %s913_s29 = sshll.u32 %s825_s18, 8 }
  0x17   : > { %s1150_s26 = scalar_select %p903_p11, 1, 0 }
  0x18   : > { %s1151_s27 = scalar_select %p907_p12, 1, 0 }
  0x19   : > { %s917_s30 = sshll.u32 %s175_s28, 4  ;;  %p919_p13 = pnand %p590_p10, %p43_p5 }
  0x1a   : > { %s194_s6 = sand.u32 1, %s825_s18   ;;  %s1153_s1 = sld [smem:[#allocation16_spill]] }
  0x1b   : > { %s1152_s5 = scalar_select %p919_p13, 1, 0 }
  0x1c   : > { %s198_s10 = scalar_lea.vmem [#allocation5], %s917_s30  ;;  %s934_s12 = scalar_lea.sflag [#allocation6], %s194_s6 }
  0x1d   : > { %s206_s11 = sshll.u32 %s198_s10, 4  ;;  %p940_p2 = pneg %p919_p13  ;;  %s931_s11 = int_to_ptr.vmem [resolvable:$true] %s206_s11 }
  0x20   : > { %s928_s9 = scalar_lea.hbm %s1153_s1, %s913_s29  ;;  %s638_s23 = scalar_lea.hbm %s1153_s1, 512 }
  0x21   : > { %s633_s13 = scalar_lea.hbm %s928_s9, 256  ;;  %p639_p5 = scmp.lt.u32.totalorder %s928_s9, %s1153_s1 }
  0x22   : > { %p634_p1 = scmp.ne.s32.totalorder %s928_s9, %s633_s13  ;;  %p640_p7 = scmp.lt.u32.totalorder %s638_s23, %s633_s13 }
  0x23   : > { %p642_p10 = scmp.lt.u32.totalorder %s633_s13, %s928_s9 }
  0x24   : > { %p636_p3 = pnand %p940_p2, %p634_p1  ;;  %p641_p8 = por %p640_p7, %p639_p5 }
  0x26   : > { %p637_p4 = pneg %p636_p3  ;;  %p643_p9 = por %p642_p10, %p641_p8 }
  0x28   : > { %p644_p0 = pnand %p643_p9, %p637_p4 }
  0x2a   : > { %647 = shalt.err (!%p644_p0)
}
  0x2b   : > { %s648_s6 = scalar_lea.vmem %s931_s11, 256  ;;  %s827_s10 = smov [#allocation5]  }
  0x2c   : > { %p649_p1 = scmp.ne.s32.totalorder %s931_s11, %s648_s6  ;;  %s653_s20 = sshll.u32 %s827_s10, 4  ;;  %s654_s20 = int_to_ptr.vmem [resolvable:$false] %s653_s20 }
  0x2d   : > { %s655_s22 = scalar_lea.vmem %s654_s20, 512  ;;  %p656_p11 = scmp.lt.s32.totalorder %s931_s11, %s654_s20 }
  0x2e   : > { %p651_p3 = pnand %p649_p1, %p940_p2  ;;  %p657_p6 = scmp.lt.s32.totalorder %s655_s22, %s648_s6 }
  0x30   : > { %p652_p12 = pneg %p651_p3  ;;  %p658_p5 = por %p657_p6, %p656_p11 }
  0x32   : > { %p659_p7 = pnand %p658_p5, %p652_p12 }
  0x34   : > { %662 = shalt.err (!%p659_p7)
}
  0x35   : > { %579 = dma.hbm_to_vmem [thread:$0]  (!%p919_p13), %s928_s9, 256, %s931_s11, %s934_s12  }
  0x36   : > { %p230_p9 = scmp.lt.s32.totalorder %s825_s18, 3  ;;  %s969_s7 = scalar_lea.hbm %s1138_s0, %s913_s29 }
  0x37   : > { %p1155_p6 = scmp.ge.s32.totalorder %s825_s18, 1  ;;  %s179_s6 = scalar_lea.vmem [#allocation2], %s917_s30 }
  0x38   : > { %s187_s10 = sshll.u32 %s179_s6, 4  ;;  %s176_s9 = scalar_lea.sflag [#allocation3], %s175_s28  ;;  %s188_s10 = int_to_ptr.vmem [resolvable:$true] %s187_s10 }
  0x39   : > { %p973_p11 = pnand %p1155_p6, %p230_p9  ;;  %s663_s11 = scalar_lea.hbm %s969_s7, 256 }
  0x3a   : > { %p664_p12 = scmp.ne.s32.totalorder %s969_s7, %s663_s11  ;;  %s668_s13 = scalar_lea.hbm %s1138_s0, 512 }
  0x3b   : > { %s1156_s8 = scalar_select %p973_p11, 1, 0 }
  0x3c   : > { %p666_p0 = pnand %p664_p12, %p940_p2  ;;  %p669_p8 = scmp.lt.u32.totalorder %s969_s7, %s1138_s0 }
  0x3d   : > { %p670_p10 = scmp.lt.u32.totalorder %s668_s13, %s663_s11  ;;  %p672_p3 = scmp.lt.u32.totalorder %s663_s11, %s969_s7 }
  0x3e   : > { %p667_p4 = pneg %p666_p0 }
  0x3f   : > { %p671_p1 = por %p670_p10, %p669_p8 }
  0x41   : > { %p673_p5 = por %p672_p3, %p671_p1 }
  0x43   : > { %p674_p7 = pnand %p673_p5, %p667_p4 }
  0x45   : > { %677 = shalt.err (!%p674_p7)
}
  0x46   : > { %s678_s28 = scalar_lea.vmem %s188_s10, 256  ;;  %s828_s6 = smov [#allocation2]  }
  0x47   : > { %p679_p9 = scmp.ne.s32.totalorder %s188_s10, %s678_s28  ;;  %s683_s24 = sshll.u32 %s828_s6, 4  ;;  %s684_s24 = int_to_ptr.vmem [resolvable:$false] %s683_s24 }
  0x48   : > { %s685_s20 = scalar_lea.vmem %s684_s24, 512  ;;  %p686_p0 = scmp.lt.s32.totalorder %s188_s10, %s684_s24 }
  0x49   : > { %p681_p6 = pnand %p679_p9, %p940_p2  ;;  %p687_p11 = scmp.lt.s32.totalorder %s685_s20, %s678_s28 }
  0x4b   : > { %p682_p12 = pneg %p681_p6  ;;  %p688_p13 = por %p687_p11, %p686_p0 }
  0x4d   : > { %p689_p8 = pnand %p688_p13, %p682_p12 }
  0x4f   : > { %692 = shalt.err (!%p689_p8)
}
  0x50   : > { %p1157_p10 = scmp.ne.s32.totalorder %s1152_s5, 0  ;;  %s1001_s22 = scalar_lea.hbm %s1140_s2, %s913_s29 }
  0x51   : > { %s217_s24 = scalar_lea.vmem [#allocation7], %s917_s30  ;;  %s693_s23 = scalar_lea.hbm %s1001_s22, 256 }
  0x52   : > { %576 = dma.hbm_to_vmem [thread:$0]  (!%p1157_p10), %s969_s7, 256, %s188_s10, %s176_s9  }
  0x53   : > { %s225_s13 = sshll.u32 %s217_s24, 4  ;;  %p694_p13 = scmp.ne.s32.totalorder %s1001_s22, %s693_s23  ;;  %s226_s13 = int_to_ptr.vmem [resolvable:$true] %s225_s13 }
  0x54   : > { %s698_s7 = scalar_lea.hbm %s1140_s2, 512  ;;  %p699_p1 = scmp.lt.u32.totalorder %s1001_s22, %s1140_s2 }
  0x55   : > { %p696_p11 = pnand %p694_p13, %p940_p2  ;;  %p700_p3 = scmp.lt.u32.totalorder %s698_s7, %s693_s23 }
  0x56   : > { %p702_p7 = scmp.lt.u32.totalorder %s693_s23, %s1001_s22 }
  0x57   : > { %p697_p4 = pneg %p696_p11  ;;  %p701_p5 = por %p700_p3, %p699_p1 }
  0x59   : > { %p703_p9 = por %p702_p7, %p701_p5 }
  0x5b   : > { %p704_p6 = pnand %p703_p9, %p697_p4 }
  0x5d   : > { %707 = shalt.err (!%p704_p6)
}
  0x5e   : > { %s708_s29 = scalar_lea.vmem %s226_s13, 256  ;;  %s829_s30 = smov [#allocation7]  }
  0x5f   : > { %p709_p12 = scmp.ne.s32.totalorder %s226_s13, %s708_s29  ;;  %s713_s20 = sshll.u32 %s829_s30, 4  ;;  %s714_s20 = int_to_ptr.vmem [resolvable:$false] %s713_s20 }
  0x60   : > { %s715_s1 = scalar_lea.vmem %s714_s20, 512  ;;  %p716_p13 = scmp.lt.s32.totalorder %s226_s13, %s714_s20 }
  0x61   : > { %p711_p0 = pnand %p709_p12, %p940_p2  ;;  %p717_p11 = scmp.lt.s32.totalorder %s715_s1, %s708_s29 }
  0x63   : > { %p712_p8 = pneg %p711_p0  ;;  %p718_p10 = por %p717_p11, %p716_p13 }
  0x65   : > { %p719_p1 = pnand %p718_p10, %p712_p8 }
  0x67   : > { %722 = shalt.err (!%p719_p1)
}
  0x68   : > { %p1158_p3 = scmp.ne.s32.totalorder %s1152_s5, 0  ;;  %p1159_p4 = scmp.ne.s32.totalorder %s1156_s8, 0 }
  0x69   : > { %s1025_s14 = sand.u32 (!%p1159_p4), 1, %s817_s16   ;;  %p1160_p2 = scmp.ne.s32.totalorder (!%p1159_p4), %s1149_s25, 0 }
  0x6a   : > { %582 = dma.hbm_to_vmem [thread:$0]  (!%p1158_p3), %s1001_s22, 256, %s226_s13, %s934_s12  }
  0x6b   : > { %234 = sbr.rel (%p1159_p4) target bundleno = 171 (0xab), region = 32  ;;  %s1028_s11 = sshll.u32 (!%p1159_p4), %s1025_s14, 4 }
  0x6c   : > { %s237_s24 = scalar_lea.sflag (!%p1159_p4), [#allocation3], %s1025_s14  ;;  %s240_s23 = scalar_lea.vmem (!%p1159_p4), [#allocation2], %s1028_s11 }
  0x72   : > { %796 = dma.done.wait (%p1160_p2), %s237_s24, 256  }
  0x73   : > { %798 = vsyncadd (%p1160_p2), %s237_s24, 4294967040  ;;  %s245_s5 = sand.u32 1, %s878_s19   ;;  %s249_s8 = scalar_lea.vmem [#allocation5], %s1028_s11 }
  0x74   : > { %s246_s12 = scalar_lea.sflag [#allocation6], %s245_s5 }
  0x75   : > { %800 = dma.done.wait (%p1160_p2), %s246_s12, 512  }
  0x76   : > { %802 = vsyncadd (%p1160_p2), %s246_s12, 4294966784  ;;  %v305_v0 = vld [vmem:[%s240_s23] sm:$0xff]  ;;  %s258_s22 = scalar_lea.vmem [#allocation7], %s1028_s11  ;;  %s561_s13 = sshll.u32 %s878_s19, 8  ;;  %v306_v4 = vld [vmem:[%s240_s23 + $0x8] sm:$0xff] }
  0x77   : > { %v1043_v1 = vld [vmem:[%s258_s22] sm:$0xff]  ;;  %s297_s28 = scalar_lea.vmem [#allocation9], %s1028_s11  ;;  %v315_v2 = vadd.f32 1e-08, %v305_v0  ;;  %v325_v3 = vsub.f32 1.0, %v305_v0  ;;  %v1047_v5 = vld [vmem:[%s258_s22 + $0x8] sm:$0xff]  ;;  %s1055_s10 = scalar_lea.hbm %s1142_s4, %s561_s13 }
  0x78   : > { %s387_s6 = sshll.u32 %s297_s28, 4  ;;  %v316_v6 = vadd.f32 1e-08, %v306_v4  ;;  %v326_v7 = vsub.f32 1.0, %v306_v4  ;;  %351 = vst [vmem:[%s297_s28] sm:$0xff] %v1043_v1  ;;  %352 = vst [vmem:[%s297_s28 + $0x8] sm:$0xff] %v1047_v5  ;;  %s359_s9 = scalar_lea.sflag [#allocation10], %s1025_s14  ;;  %s1057_s6 = int_to_ptr.vmem [resolvable:$true] %s387_s6 }
  0x79   : > { %625 = vlog2.f32 %v315_v2  ;;  %v327_v8 = vadd.f32 1e-08, %v325_v3  ;;  %s723_s29 = scalar_lea.vmem %s1057_s6, 256  ;;  %p1161_p5 = scmp.ne.s32.totalorder %s1150_s26, 0 }
  0x7a   : > { %627 = vlog2.f32 %v316_v6  ;;  %v328_v9 = vadd.f32 1e-08, %v326_v7  ;;  %p724_p10 = scmp.ne.s32.totalorder %s1057_s6, %s723_s29  ;;  %s830_s30 = smov [#allocation9]  }
  0x7b   : > { %629 = vlog2.f32 %v327_v8  ;;  %s727_s20 = sshll.u32 %s830_s30, 4  ;;  %s728_s20 = int_to_ptr.vmem [resolvable:$false] %s727_s20 }
  0x7c   : > { %631 = vlog2.f32 %v328_v9  ;;  %p725_p7 = pnand %p724_p10, %p1161_p5  ;;  %s729_s1 = scalar_lea.vmem %s728_s20, 512 }
  0x7d   : > { %p730_p6 = scmp.lt.s32.totalorder %s1057_s6, %s728_s20  ;;  %p731_p12 = scmp.lt.s32.totalorder %s729_s1, %s723_s29 }
  0x7e   : > { %p726_p9 = pneg %p725_p7 }
  0x7f   : > { %p732_p0 = por %p731_p12, %p730_p6 }
  0x81   : > { %p733_p8 = pnand %p732_p0, %p726_p9 }
  0x83   : > { %736 = shalt.err (!%p733_p8)
}
  0x84   : > { %s737_s24 = scalar_lea.hbm %s1055_s10, 256  ;;  %s741_s12 = scalar_lea.hbm %s1142_s4, 512 }
  0x85   : > { %p738_p13 = scmp.ne.s32.totalorder %s1055_s10, %s737_s24  ;;  %p742_p3 = scmp.lt.u32.totalorder %s1055_s10, %s1142_s4 }
  0x86   : > { %p743_p4 = scmp.lt.u32.totalorder %s741_s12, %s737_s24  ;;  %p745_p10 = scmp.lt.u32.totalorder %s737_s24, %s1055_s10 }
  0x87   : > { %p739_p11 = pnand %p738_p13, %p1161_p5 }
  0x88   : > { %p744_p2 = por %p743_p4, %p742_p3 }
  0x89   : > { %p740_p1 = pneg %p739_p11 }
  0x8a   : > { %p746_p7 = por %p745_p10, %p744_p2 }
  0x8c   : > { %p747_p9 = pnand %p746_p7, %p740_p1 }
  0x8e   : > { %750 = shalt.err (!%p747_p9)
}
  0x8f   : > { %570 = dma.vmem_to_hbm [thread:$0]  (%p1161_p5), %s1057_s6, 256, %s1055_s10, %s359_s9   ;;  %v309_v10 = vld [vmem:[%s249_s8] sm:$0xff]  ;;  %v310_v11 = vld [vmem:[%s249_s8 + $0x8] sm:$0xff]  ;;  %v626_v12 = vpop.eup %625 }
  0x90   : > { %v628_v13 = vpop.eup %627  ;;  %v318_v14 = vmul.f32 0.6931472, %v626_v12  ;;  %v323_v15 = vsub.f32 1.0, %v309_v10  ;;  %v324_v18 = vsub.f32 1.0, %v310_v11  ;;  %s290_s8 = scalar_lea.vmem [#allocation8], %s1028_s11  ;;  %s1094_s10 = scalar_lea.hbm %s1141_s3, %s561_s13 }
  0x91   : > { %v630_v16 = vpop.eup %629  ;;  %v320_v17 = vmul.f32 0.6931472, %v628_v13  ;;  %s373_s6 = sshll.u32 %s290_s8, 4  ;;  %s354_s9 = scalar_lea.sflag [#allocation4], %s1025_s14  ;;  %s1096_s6 = int_to_ptr.vmem [resolvable:$true] %s373_s6 }
  0x92   : > { %v632_v19 = vpop.eup %631  ;;  %v321_v20 = vmul.f32 %v318_v14, %v309_v10  ;;  %v330_v21 = vmul.f32 0.6931472, %v630_v16  ;;  %s751_s29 = scalar_lea.vmem %s1096_s6, 256  ;;  %s831_s11 = smov [#allocation8]  }
  0x93   : > { %v322_v22 = vmul.f32 %v320_v17, %v310_v11  ;;  %v332_v23 = vmul.f32 0.6931472, %v632_v19  ;;  %p752_p6 = scmp.ne.s32.totalorder %s1096_s6, %s751_s29  ;;  %s755_s19 = sshll.u32 %s831_s11, 4  ;;  %s756_s19 = int_to_ptr.vmem [resolvable:$false] %s755_s19 }
  0x94   : > { %v333_v24 = vmul.f32 %v330_v21, %v323_v15  ;;  %s757_s30 = scalar_lea.vmem %s756_s19, 512  ;;  %p758_p8 = scmp.lt.s32.totalorder %s1096_s6, %s756_s19 }
  0x95   : > { %v334_v25 = vmul.f32 %v332_v23, %v324_v18  ;;  %p753_p12 = pnand %p752_p6, %p1161_p5  ;;  %p759_p13 = scmp.lt.s32.totalorder %s757_s30, %s751_s29 }
  0x96   : > { %v335_v26 = vadd.f32 %v333_v24, %v321_v20 }
  0x97   : > { %v336_v27 = vadd.f32 %v334_v25, %v322_v22  ;;  %p754_p0 = pneg %p753_p12  ;;  %p760_p11 = por %p759_p13, %p758_p8 }
  0x98   : > { %v337_v28 = vsub.f32 0.0, %v335_v26 }
  0x99   : > { %v338_v29 = vsub.f32 0.0, %v336_v27  ;;  %p761_p1 = pnand %p760_p11, %p754_p0 }
  0x9a   : > { %v341_v30 = vmul.f32 %v337_v28, %v1043_v1 }
  0x9b   : > { %v342_v31 = vmul.f32 %v338_v29, %v1047_v5 }
  0x9c   : > { %345 = vst [vmem:[%s290_s8] sm:$0xff] %v341_v30 }
  0x9d   : > { %346 = vst [vmem:[%s290_s8 + $0x8] sm:$0xff] %v342_v31 }
  0x9e   : > { %764 = shalt.err (!%p761_p1)
}
  0x9f   : > { %s765_s14 = scalar_lea.hbm %s1094_s10, 256  ;;  %s769_s1 = scalar_lea.hbm %s1141_s3, 512 }
  0xa0   : > { %p766_p3 = scmp.ne.s32.totalorder %s1094_s10, %s765_s14  ;;  %p770_p10 = scmp.lt.u32.totalorder %s1094_s10, %s1141_s3 }
  0xa1   : > { %p771_p7 = scmp.lt.u32.totalorder %s769_s1, %s765_s14  ;;  %p773_p6 = scmp.lt.u32.totalorder %s765_s14, %s1094_s10 }
  0xa2   : > { %p767_p4 = pnand %p766_p3, %p1161_p5 }
  0xa3   : > { %p772_p9 = por %p771_p7, %p770_p10 }
  0xa4   : > { %p768_p2 = pneg %p767_p4 }
  0xa5   : > { %p774_p12 = por %p773_p6, %p772_p9 }
  0xa7   : > { %p775_p0 = pnand %p774_p12, %p768_p2 }
  0xa9   : > { %778 = shalt.err (!%p775_p0)
}
  0xaa   : > { %569 = dma.vmem_to_hbm [thread:$0]  (%p1161_p5), %s1096_s6, 256, %s1094_s10, %s354_s9  }
  0xab PF: > { %s399_s5 = sand.u32 1, %s813_s15   ;;  %p1162_p8 = scmp.ne.s32.totalorder %s1151_s27, 0 }
  0xac   : > { %p1163_p13 = scmp.ge.s32.totalorder %s825_s18, 2  ;;  %s400_s12 = scalar_lea.sflag [#allocation4], %s399_s5 }
  0xae   : > { %p584_p11 = pnand %p1163_p13, %p1162_p8 }
  0xb0   : > { %804 = dma.done.wait (!%p584_p11), %s400_s12, 256  }
  0xb1   : > { %806 = vsyncadd (!%p584_p11), %s400_s12, 4294967040  ;;  %s409_s22 = scalar_lea.sflag [#allocation10], %s399_s5 }
  0xb2   : > { %808 = dma.done.wait (!%p584_p11), %s409_s22, 256  }
  0xb3   : > { %810 = vsyncadd (!%p584_p11), %s409_s22, 4294967040  ;;  %s1164_s26 = sld [smem:[#allocation15_spill]]  ;;  %p24_p5 = scmp.ge.s32.totalorder %s882_s21, 4  }
  0xb4   : > { %s1165_s15 = smov %s817_s16  ;;  %s1166_s16 = smov %s821_s17 }
  0xb5   : > { %s1168_s18 = smov %s882_s21  ;;  %26 = sbr.rel (!%p24_p5) target bundleno = 11 (0xb), region = 121 }
  0xb9   : > { %s1167_s17 = smov %s1164_s26 }
  0xbc   :  { %414 = vsyncpa [#allocation3], 1 }
  0xbd   :  { %416 = vsyncpa [#allocation3 + $0x1], 1 }
  0xbe   :  { %417 = vsyncpa [#allocation6], 1 }
  0xbf   :  { %419 = vsyncpa [#allocation6 + $0x1], 1 }
  0xc0   :  { %420 = vsyncpa [#allocation4], 1 }
  0xc1   :  { %422 = vsyncpa [#allocation4 + $0x1], 1 }
  0xc2   :  { %423 = vsyncpa [#allocation10], 1 }
  0xc3   :  { %425 = vsyncpa [#allocation10 + $0x1], 1 }

</bundles_post_ra>
